<compile_context>
chip_gen: v5e
topology: v5e:2x2
jax: 0.10.0
libtpu: 0.0.40
codegen_flags: <defaults>
</compile_context>

<pallas_src>
import math

import jax
import jax.numpy as jnp
from jax.experimental import pallas as pl
from jax.experimental.pallas import tpu as pltpu

LEAKY_RELU_NEG_SLOPE = 0.01  # stand-in for config.LeakyReLU_leak


def _round_up(x, m):
    return ((x + m - 1) // m) * m


def _conv1x1_kernel(x_ref, w_ref, b_ref, o_ref):
    # x_ref: (TB, C_in, TN)   NCHW-native pixel tile (channels x lanes)
    # w_ref: (C_out, C_in)    full weight
    # b_ref: (C_out, 1)       bias column
    # o_ref: (TB, C_out, TN)  lane-dense output tile
    w = w_ref[...]
    bias = b_ref[...]
    for i in range(x_ref.shape[0]):          # static TB-way unroll (TB <= 8)
        acc = jnp.dot(w, x_ref[i], preferred_element_type=jnp.float32)
        o_ref[i] = (acc + bias).astype(o_ref.dtype)


def conv1x1_nchw_pallas(x3d, w2d, b_col, *, tn=16384,
                        target_step_bytes=2 << 20, max_tb=8):
    """x3d: [B, C_in, P] f32, w2d: [C_out, C_in], b_col: [C_out, 1] -> [B, C_out, P]."""
    B, C_in, P = x3d.shape
    C_out = w2d.shape[0]
    bytes_per_pixel = 4 * (C_in + C_out)          # f32 in + out streams

    # Lane tile: multiple of 128, capped at `tn`. No explicit padding —
    # Pallas masks the ragged final tile on load/store.
    TN = min(tn, _round_up(P, 128))
    n_tiles = pl.cdiv(P, TN)

    # Batch blocking: when one image's tile moves little data, cover several
    # images per grid step so each step moves ~target_step_bytes of HBM traffic.
    TB = max(1, min(B, max_tb, target_step_bytes // (bytes_per_pixel * TN)))
    n_bblocks = pl.cdiv(B, TB)

    # v7x megacore: guarantee >= 2 grid steps so both TensorCores get work.
    if n_bblocks * n_tiles < 2:
        if P > 128:
            TN = _round_up(pl.cdiv(P, 2), 128)
            n_tiles = pl.cdiv(P, TN)
        elif B > 1:
            TB = pl.cdiv(B, 2)
            n_bblocks = pl.cdiv(B, TB)

    # Double-buffered in/out blocks + tiny weights; give explicit headroom
    # (v5e default scoped VMEM limit is only 16 MiB), capped well under v7x's
    # 64 MiB physical VMEM.
    block_bytes = 4 * TB * TN * (C_in + C_out)
    vmem_limit = min(max(2 * block_bytes + (2 << 20), 32 << 20), 48 << 20)

    cost = pl.CostEstimate(
        flops=2 * B * C_in * C_out * P,
        transcendentals=0,
        bytes_accessed=4 * B * P * (C_in + C_out) + 4 * C_out * (C_in + 1),
    )

    return pl.pallas_call(
        _conv1x1_kernel,
        out_shape=jax.ShapeDtypeStruct((B, C_out, P), x3d.dtype),
        grid_spec=pltpu.PrefetchScalarGridSpec(
            num_scalar_prefetch=0,
            grid=(n_bblocks, n_tiles),
            in_specs=[
                pl.BlockSpec((TB, C_in, TN), lambda b, t: (b, 0, t)),
                pl.BlockSpec((C_out, C_in), lambda b, t: (0, 0)),
                pl.BlockSpec((C_out, 1), lambda b, t: (0, 0)),
            ],
            out_specs=pl.BlockSpec((TB, C_out, TN), lambda b, t: (b, 0, t)),
        ),
        compiler_params=pltpu.CompilerParams(
            dimension_semantics=("parallel", "parallel"),
            vmem_limit_bytes=vmem_limit,
        ),
        cost_estimate=cost,
    )(x3d, w2d, b_col)


class FromImagePallas:
    """JAX/Pallas equivalent of the PyTorch FromImage module (1x1 conv)."""

    def __init__(self, N_colors, out_channels, key,
                 neg_slope=LEAKY_RELU_NEG_SLOPE):
        self.N_colors = N_colors
        self.out_channels = out_channels
        # Kaiming-normal init, mode='fan_in', nonlinearity='leaky_relu':
        #   gain = sqrt(2 / (1 + a^2)),  std = gain / sqrt(fan_in)
        fan_in = N_colors * 1 * 1
        gain = math.sqrt(2.0 / (1.0 + neg_slope ** 2))
        std = gain / math.sqrt(fan_in)
        # PyTorch conv weight shape: [out_channels, in_channels, 1, 1]
        self.weight = std * jax.random.normal(
            key, (out_channels, N_colors, 1, 1), dtype=jnp.float32)
        self.bias = jnp.zeros((out_channels,), dtype=jnp.float32)
        # Precompute matmul-friendly views once (no per-call XLA transpose).
        self.w2d = self.weight[:, :, 0, 0]                 # [C_out, C_in]
        self.b_col = self.bias.reshape(out_channels, 1)    # [C_out, 1]

    def __call__(self, x):
        # x: NCHW [B, N_colors, H, W]
        B, C_in, H, W = x.shape
        assert C_in == self.N_colors
        # NCHW-native: contiguous reshape, no transposes, no padding copies.
        x3d = x.reshape(B, C_in, H * W)
        y3d = conv1x1_nchw_pallas(x3d, self.w2d, self.b_col)
        return y3d.reshape(B, self.out_channels, H, W)


def _reference(module, x):
    w2d = module.weight[:, :, 0, 0]  # [C_out, C_in]
    return (jnp.einsum("bchw,oc->bohw", x, w2d)
            + module.bias[None, :, None, None])


if __name__ == "__main__":
    key = jax.random.PRNGKey(0)
    k_x, k_w, k_x2, k_x3 = jax.random.split(key, 4)

    B, N_colors, H, W = 2, 4, 16, 16
    out_channels = 32

    module = FromImagePallas(N_colors, out_channels, k_w)

    # Case 1: P multiple of 128; exercises batch blocking + megacore split.
    x = jax.random.normal(k_x, (B, N_colors, H, W), dtype=jnp.float32)
    y = jax.block_until_ready(module(x))
    assert y.shape == (B, out_channels, H, W)
    assert jnp.allclose(y, _reference(module, x), atol=1e-5, rtol=1e-5)

    # Case 2: odd pixel count < 128 (single ragged, masked tile; no padding).
    x2 = jax.random.normal(k_x2, (1, N_colors, 5, 5), dtype=jnp.float32)
    y2 = jax.block_until_ready(module(x2))
    assert y2.shape == (1, out_channels, 5, 5)
    assert jnp.allclose(y2, _reference(module, x2), atol=1e-5, rtol=1e-5)

    # Case 3: batch blocking + ragged final pixel tile (P=135, two tiles).
    x3 = jax.random.normal(k_x3, (3, N_colors, 9, 15), dtype=jnp.float32)
    y3 = jax.block_until_ready(module(x3))
    assert y3.shape == (3, out_channels, 9, 15)
    assert jnp.allclose(y3, _reference(module, x3), atol=1e-5, rtol=1e-5)

    print("KERNEL_OK")
</pallas_src>

<mosaic_0001>
module attributes {stable_mosaic.version = 11 : i64} {
  func.func @_conv1x1_kernel(%arg0: i32, %arg1: i32, %arg2: memref<2x4x128xf32, #tpu.memory_space<vmem>>, %arg3: memref<32x4xf32, #tpu.memory_space<vmem>>, %arg4: memref<32x1xf32, #tpu.memory_space<vmem>>, %arg5: memref<2x32x128xf32, #tpu.memory_space<vmem>>) attributes {dimension_semantics = [#tpu.dimension_semantics<parallel>, #tpu.dimension_semantics<parallel>], iteration_bounds = array<i64: 1, 2>, scalar_prefetch = 0 : i64, scratch_operands = 0 : i64, tpu.core_type = #tpu.core_type<tc>, window_params = [{transform_indices = @transform_0, window_bounds = array<i64: 2, 4, 128>}, {pipeline_mode = #tpu.pipeline_mode<synchronous>, transform_indices = @transform_1, window_bounds = array<i64: 32, 4>}, {pipeline_mode = #tpu.pipeline_mode<synchronous>, transform_indices = @transform_2, window_bounds = array<i64: 32, 1>}, {transform_indices = @transform_3, window_bounds = array<i64: 2, 32, 128>}]} {
    %c0 = arith.constant 0 : index
    %c0_0 = arith.constant 0 : index
    %0 = vector.load %arg3[%c0, %c0_0] : memref<32x4xf32, #tpu.memory_space<vmem>>, vector<32x4xf32>
    %c0_1 = arith.constant 0 : index
    %c0_2 = arith.constant 0 : index
    %1 = vector.load %arg4[%c0_1, %c0_2] : memref<32x1xf32, #tpu.memory_space<vmem>>, vector<32x1xf32>
    %c0_3 = arith.constant 0 : index
    %c0_4 = arith.constant 0 : index
    %c0_5 = arith.constant 0 : index
    %2 = vector.load %arg2[%c0_3, %c0_4, %c0_5] : memref<2x4x128xf32, #tpu.memory_space<vmem>>, vector<1x4x128xf32>
    %3 = vector.shape_cast %2 : vector<1x4x128xf32> to vector<4x128xf32>
    %cst = arith.constant dense<0.000000e+00> : vector<32x128xf32>
    %4 = tpu.matmul %0, %3, %cst {dimension_numbers = #tpu.dot_dimension_numbers<[1], [0], [0], [1], [0, 0, 1, 1], [], []>} : vector<32x4xf32>, vector<4x128xf32>, vector<32x128xf32> -> vector<32x128xf32>
    %5 = vector.broadcast %1 : vector<32x1xf32> to vector<32x128xf32>
    %6 = arith.addf %4, %5 : vector<32x128xf32>
    %c0_6 = arith.constant 0 : index
    %c0_7 = arith.constant 0 : index
    %c0_8 = arith.constant 0 : index
    %7 = vector.load %arg5[%c0_6, %c0_7, %c0_8] : memref<2x32x128xf32, #tpu.memory_space<vmem>>, vector<1x32x128xf32>
    %8 = vector.shape_cast %7 : vector<1x32x128xf32> to vector<32x128xf32>
    %9 = vector.shape_cast %6 : vector<32x128xf32> to vector<1x32x128xf32>
    tpu.vector_store %arg5[%c0_6, %c0_7, %c0_8], %9 {strides = array<i32>} : memref<2x32x128xf32, #tpu.memory_space<vmem>>, vector<1x32x128xf32>,
    %c1 = arith.constant 1 : index
    %c0_9 = arith.constant 0 : index
    %c0_10 = arith.constant 0 : index
    %10 = vector.load %arg2[%c1, %c0_9, %c0_10] : memref<2x4x128xf32, #tpu.memory_space<vmem>>, vector<1x4x128xf32>
    %11 = vector.shape_cast %10 : vector<1x4x128xf32> to vector<4x128xf32>
    %cst_11 = arith.constant dense<0.000000e+00> : vector<32x128xf32>
    %12 = tpu.matmul %0, %11, %cst_11 {dimension_numbers = #tpu.dot_dimension_numbers<[1], [0], [0], [1], [0, 0, 1, 1], [], []>} : vector<32x4xf32>, vector<4x128xf32>, vector<32x128xf32> -> vector<32x128xf32>
    %13 = vector.broadcast %1 : vector<32x1xf32> to vector<32x128xf32>
    %14 = arith.addf %12, %13 : vector<32x128xf32>
    %c1_12 = arith.constant 1 : index
    %c0_13 = arith.constant 0 : index
    %c0_14 = arith.constant 0 : index
    %15 = vector.load %arg5[%c1_12, %c0_13, %c0_14] : memref<2x32x128xf32, #tpu.memory_space<vmem>>, vector<1x32x128xf32>
    %16 = vector.shape_cast %15 : vector<1x32x128xf32> to vector<32x128xf32>
    %17 = vector.shape_cast %14 : vector<32x128xf32> to vector<1x32x128xf32>
    tpu.vector_store %arg5[%c1_12, %c0_13, %c0_14], %17 {strides = array<i32>} : memref<2x32x128xf32, #tpu.memory_space<vmem>>, vector<1x32x128xf32>,
    return
  }
  func.func @transform_0(%arg0: i32, %arg1: i32) -> (i32, i32, i32) {
    %c0_i32 = arith.constant 0 : i32
    %c0_i32_0 = arith.constant 0 : i32
    return %arg0, %c0_i32, %arg1 : i32, i32, i32
  }
  func.func @transform_1(%arg0: i32, %arg1: i32) -> (i32, i32) {
    %c0_i32 = arith.constant 0 : i32
    %c0_i32_0 = arith.constant 0 : i32
    %c0_i32_1 = arith.constant 0 : i32
    return %c0_i32, %c0_i32_0 : i32, i32
  }
  func.func @transform_2(%arg0: i32, %arg1: i32) -> (i32, i32) {
    %c0_i32 = arith.constant 0 : i32
    %c0_i32_0 = arith.constant 0 : i32
    %c0_i32_1 = arith.constant 0 : i32
    return %c0_i32, %c0_i32_0 : i32, i32
  }
  func.func @transform_3(%arg0: i32, %arg1: i32) -> (i32, i32, i32) {
    %c0_i32 = arith.constant 0 : i32
    %c0_i32_0 = arith.constant 0 : i32
    return %arg0, %c0_i32, %arg1 : i32, i32, i32
  }
}

</mosaic_0001>

<bundles_post_ra>
// kernel: tpu_custom_call.1
= control target key start
LH: loop header
LB: loop body
LE: loop exit
PB: predicated region body
PF: predicated region fallthrough
CT: control target
= control target key end

     0   :  { %8 = vsyncpa [#allocation4], 0  ;;  %s794_s0 = inlined_call_operand.vmem [shape: f32[2,4,256], index: 0, kind: input, shape index: {}]   ;;  %s795_s1 = inlined_call_operand.vmem [shape: f32[32,4], index: 1, kind: input, shape index: {}]   ;;  %s796_s2 = inlined_call_operand.vmem [shape: f32[32,1], index: 2, kind: input, shape index: {}]   ;;  %s797_s3 = inlined_call_operand.hbm [shape: f32[2,32,256], index: 3, kind: output, shape index: {}]  }
   0x1   :  { %10 = vsyncpa [#allocation4 + $0x1], 0  ;;  %s648_s12 = smov 0   ;;  %s650_s13 = smov 0  }
   0x2   :  { %s652_s14 = smov 0   ;;  %s654_s15 = smov 0  }
   0x3   :  { %s656_s16 = smov 0   ;;  %s658_s17 = smov 0  }
   0x4 LB: > { %s453_s18 = sadd.s32 4294967295, %s622_s17   ;;  %s454_s19 = sadd.s32 4294967294, %s622_s17   ;;  %s622_s17 = sphi %s658_s17, %s16_s17   ;;  %s618_s16 = sphi %s656_s16, %s804_s16   ;;  %s614_s15 = sphi %s654_s15, %s803_s15   ;;  %s610_s14 = sphi %s652_s14, %s802_s14   ;;  %s606_s13 = sphi %s650_s13, %s801_s13   ;;  %s602_s12 = sphi %s648_s12, %s800_s12  }
   0x5   : > { %s25_s20 = sadd.s32 1, %s618_s16  ;;  %s37_s21 = sadd.s32 1, %s610_s14 }
   0x6   : > { %p26_p0 = scmp.ge.s32.totalorder %s25_s20, 2  ;;  %p44_p1 = scmp.ne.s32.totalorder %s610_s14, %s606_s13 }
   0x7   : > { %p45_p2 = scmp.eq.s32.totalorder %s622_s17, 0  ;;  %p118_p3 = scmp.eq.s32.totalorder %s453_s18, 1 }
   0x8   : > { %s806_s20 = smov (%p26_p0, %s25_s20), 0  ;;  %p123_p6 = scmp.ne.s32.totalorder %s606_s13, %s602_s12 }
   0x9   : > { %p46_p4 = por %p45_p2, %p44_p1  ;;  %p687_p5 = por %p118_p3, %p44_p1 }
   0xa   : > { %s33_s23 = ssub.s32 %s618_s16, %s806_s20  ;;  %p124_p8 = scmp.eq.s32.totalorder %s454_s19, 1 }
   0xb   : > { %p35_p7 = scmp.eq.s32.totalorder %s33_s23, 0  ;;  %p456_p10 = scmp.ge.s32.totalorder %s622_s17, 2 }
   0xc   : > { %p698_p9 = por %p124_p8, %p123_p6 }
   0xd   : > { %s696_s24 = scalar_select %p35_p7, %s610_s14, %s37_s21  }
   0xe   : > { %146 = sbr.rel (%p456_p10) target bundleno = 25 (0x19), region = 24 }
  0x13   : > { %149 = sbr.rel (!%p46_p4) target bundleno = 25 (0x19), region = 28  ;;  %s151_s26 = sand.u32 (%p46_p4), 1, %s610_s14  }
  0x14   : > { %s458_s27 = sshll.u32 (%p46_p4), %s618_s16, 2  ;;  %s457_s28 = sshll.u32 (%p46_p4), %s151_s26, 3 }
  0x15   : > { %s158_s4 = scalar_lea.vmem (%p46_p4), %s794_s0, %s458_s27  ;;  %s153_s5 = scalar_lea.vmem (%p46_p4), [#allocation2], %s457_s28 }
  0x16   : > { %v175_v0 = vld [vmem:[%s158_s4] sm:$0xf] (%p46_p4)  ;;  %v177_v1 = vld [vmem:[%s158_s4 + $0x8] sm:$0xf] (%p46_p4) }
  0x17   : > { %176 = vst [vmem:[%s153_s5] sm:$0xf] (%p46_p4), %v175_v0 }
  0x18   : > { %178 = vst [vmem:[%s153_s5 + $0x4] sm:$0xf] %v177_v1 }
  0x19 PF: > { %p459_p11 = scmp.ge.s32.totalorder %s622_s17, 1  ;;  %p205_p12 = scmp.lt.s32.totalorder %s622_s17, 3 }
  0x1b   : > { %p206_p13 = pnand %p459_p11, %p205_p12 }
  0x1c   : > { %s713_s6 = sand.u32 (!%p206_p13), 1, %s606_s13   ;;  %s478_s11 = sshll.u32 (!%p206_p13), %s614_s15, 3 }
  0x1d   : > { %209 = sbr.rel (%p206_p13) target bundleno = 187 (0xbb), region = 69  ;;  %s460_s7 = sshll.u32 (!%p206_p13), %s713_s6, 3 }
  0x1e   : > { %s214_s21 = scalar_lea.vmem (!%p206_p13), [#allocation2], %s460_s7  ;;  %s461_s9 = sshll.u32 (!%p206_p13), %s713_s6, 6 }
  0x1f   : > { %s234_s10 = scalar_lea.vmem (!%p206_p13), [#allocation3], %s461_s9  ;;  %s356_s26 = scalar_lea.sflag (!%p206_p13), [#allocation4], %s713_s6 }
  0x20   : > { %s370_s23 = sshll.u32 (!%p206_p13), %s234_s10, 4  ;;  %s564_s4 = scalar_lea.hbm (!%p206_p13), %s797_s3, 128  ;;  %s757_s23 = int_to_ptr.vmem [resolvable:$true] %s370_s23 }
  0x22   : > { %vm279_vm0 = vcmask 1043456   ;;  %v624_v2 = vmov 0   ;;  %v243_v3 = vld [vmem:[%s796_s2 + $0x10] sm:$0xff]  ;;  %v237_v4 = vld [vmem:[%s795_s1] sm:$0xff]  ;;  %vm266_vm1 = vcmask 31744   ;;  %v244_v9 = vld [vmem:[%s796_s2 + $0x18] sm:$0xff] }
  0x23   : > { %543 = vset.pattern.permute.xlu1 %v624_v2  ;;  %542 = vset.pattern.permute.xlu0 %v624_v2  ;;  %v241_v5 = vld [vmem:[%s796_s2] sm:$0xff]  ;;  %v239_v8 = vld [vmem:[%s795_s1 + $0x10] sm:$0xff]  ;;  %v242_v10 = vld [vmem:[%s796_s2 + $0x8] sm:$0xff] }
  0x24   : > { %258 = vperm.xlu1 %543, %v243_v3   ;;  %v245_v6 = vld [vmem:[%s214_s21] sm:$0xf]  ;;  %v467_v7 = vld [vmem:[%s214_s21 + $0x4] sm:$0xf]  ;;  %248 = vperm.xlu0 %542, %v241_v5   ;;  %v240_v12 = vld [vmem:[%s795_s1 + $0x18] sm:$0xff]  ;;  %s369_s21 = scalar_lea.hbm %s797_s3, %s478_s11 }
  0x25   : > { %462 = vmatpush.msk.msra.mxu0 %vm279_vm0, %v245_v6  ;;  %481 = vmatpush.msk.msra.mxu2 %vm279_vm0, %v245_v6  ;;  %v238_v11 = vld [vmem:[%s795_s1 + $0x8] sm:$0xff]  ;;  %s372_s15 = sshll.u32 %s369_s21, 4  ;;  %s373_s15 = int_to_ptr.hbm [resolvable:$true] %s372_s15 }
  0x26   : > { %468 = vmatpush.msk.msra.mxu1 %vm279_vm0, %v467_v7  ;;  %482 = vmatpush.msk.msra.mxu3 %vm279_vm0, %v467_v7  ;;  %s558_s27 = sshra.s32 %s373_s15, 4  ;;  %s559_s27 = int_to_ptr.hbm [resolvable:$true] %s558_s27 }
  0x27   : > { %463 = vmatmul.msk.f32.vlgmr.msra.gmra.mxu0 %vm266_vm1, %v237_v4  ;;  %465 = vmatmul.msk.f32.vlgmr.msra.gmra.mxu2 %vm266_vm1, %v239_v8  ;;  %s560_s28 = scalar_lea.hbm %s559_s27, 64  ;;  %p565_p3 = scmp.lt.s32.totalorder %s559_s27, %s797_s3 }
  0x28   : > { %469 = vmatmul.msk.f32.vlgmr.msra.gmra.mxu1 %vm266_vm1, %v237_v4  ;;  %471 = vmatmul.msk.f32.vlgmr.msra.gmra.mxu3 %vm266_vm1, %v239_v8  ;;  %p561_p0 = scmp.ne.s32.totalorder %s559_s27, %s560_s28  ;;  %p566_p4 = scmp.lt.s32.totalorder %s564_s4, %s560_s28 }
  0x2a   : > { %p562_p1 = pnand %p561_p0, %p687_p5  ;;  %p567_p6 = por %p566_p4, %p565_p3 }
  0x2c   : > { %263 = vperm.xlu1 %543, %v244_v9   ;;  %253 = vperm.xlu0 %542, %v242_v10   ;;  %p563_p2 = pneg %p562_p1 }
  0x2e   : > { %p568_p7 = pnand %p567_p6, %p563_p2 }
  0x2f   : > { %464 = vmatmul.msk.f32.gmra.mxu0 %vm266_vm1, %v238_v11  ;;  %466 = vmatmul.msk.f32.gmra.mxu2 %vm266_vm1, %v240_v12 }
  0x30   : > { %470 = vmatmul.msk.f32.gmra.mxu1 %vm266_vm1, %v238_v11  ;;  %472 = vmatmul.msk.f32.gmra.mxu3 %vm266_vm1, %v240_v12 }
  0x96   : > { %v249_v13 = vpop.permute.xlu0 %248  ;;  %v259_v18 = vpop.permute.xlu1 %258 }
  0x9e   : > { %v254_v22 = vpop.permute.xlu0 %253  ;;  %v264_v28 = vpop.permute.xlu1 %263 }
  0xa4   : > { %v300_v14 = vpop.f32.mrf.mxu0 }
  0xa5   : > { %v301_v15 = vadd.f32 %v300_v14, %v249_v13  ;;  %v338_v16 = vpop.f32.mrf.mxu1 }
  0xa6   : > { %v339_v17 = vadd.f32 %v338_v16, %v249_v13 }
  0xa7   : > { %312 = vst [vmem:[%s234_s10] sm:$0xff] %v301_v15 }
  0xa8   : > { %473 = vst [vmem:[%s234_s10 + $0x20] sm:$0xff] %v339_v17 }
  0xaa   : > { %v306_v19 = vpop.f32.mrf.mxu2 }
  0xab   : > { %v307_v20 = vadd.f32 %v306_v19, %v259_v18  ;;  %v344_v21 = vpop.f32.mrf.mxu3 }
  0xac   : > { %v345_v23 = vadd.f32 %v344_v21, %v259_v18  ;;  %v303_v24 = vpop.f32.mrf.mxu0 }
  0xad   : > { %314 = vst [vmem:[%s234_s10 + $0x10] sm:$0xff] %v307_v20  ;;  %v304_v25 = vadd.f32 %v303_v24, %v254_v22  ;;  %v341_v26 = vpop.f32.mrf.mxu1 }
  0xae   : > { %475 = vst [vmem:[%s234_s10 + $0x30] sm:$0xff] %v345_v23  ;;  %v342_v27 = vadd.f32 %v341_v26, %v254_v22 }
  0xaf   : > { %313 = vst [vmem:[%s234_s10 + $0x8] sm:$0xff] %v304_v25 }
  0xb0   : > { %474 = vst [vmem:[%s234_s10 + $0x28] sm:$0xff] %v342_v27 }
  0xb2   : > { %v309_v29 = vpop.f32.mrf.mxu2 }
  0xb3   : > { %v310_v30 = vadd.f32 %v309_v29, %v264_v28  ;;  %v347_v31 = vpop.f32.mrf.mxu3 }
  0xb4   : > { %v348_v32 = vadd.f32 %v347_v31, %v264_v28 }
  0xb5   : > { %315 = vst [vmem:[%s234_s10 + $0x18] sm:$0xff] %v310_v30 }
  0xb6   : > { %476 = vst [vmem:[%s234_s10 + $0x38] sm:$0xff] %v348_v32 }
  0xb7   : > { %571 = shalt.err (!%p568_p7)
}
  0xb8   : > { %s625_s6 = smov 128   ;;  %s626_s8 = smov 256  }
  0xb9   : > { %s627_s9 = smov 8  }
  0xba   : > { %483 = dma.vmem_to_hbm [thread:$0]  (%p687_p5), %s757_s23, 1024, %s373_s15, %s356_s26, %s625_s6, %s626_s8, %s627_s9  }
  0xbb PF: > { %s387_s10 = sand.u32 1, %s602_s12   ;;  %p486_p8 = pnand %p456_p10, %p698_p9 }
  0xbc   : > { %s388_s11 = scalar_lea.sflag [#allocation4], %s387_s10 }
  0xbd   : > { %p487_p11 = pneg %p486_p8 }
  0xbf   : > { %597 = dma.done.wait (%p487_p11), %s388_s11, 1024  }
  0xc0   : > { %599 = vsyncadd (%p487_p11), %s388_s11, 4294966272  ;;  %s16_s17 = sadd.s32 1, %s622_s17   ;;  %s800_s12 = smov %s606_s13 }
  0xc1   : > { %p13_p12 = scmp.ge.s32.totalorder %s16_s17, 4   ;;  %s801_s13 = smov %s610_s14 }
  0xc2   : > { %s802_s14 = smov %s696_s24  ;;  %s803_s15 = smov %s618_s16 }
  0xc3   : > { %s804_s16 = smov %s806_s20  ;;  %15 = sbr.rel (!%p13_p12) target bundleno = 4 (0x4), region = 115 }
  0xc8   :  { %394 = vsyncpa [#allocation4], 1 }
  0xc9   :  { %396 = vsyncpa [#allocation4 + $0x1], 1 }

</bundles_post_ra>
